<compile_context>
chip_gen: v6e
topology: v6e:2x2x1
jax: 0.10.0
libtpu: 0.0.40
codegen_flags: <defaults>
</compile_context>

<pallas_src>
import functools

import jax
import jax.numpy as jnp
from jax.experimental import pallas as pl
from jax.experimental.pallas import tpu as pltpu

H_DIM_1 = 20
H_DIM_2 = 5


def _mlp_kernel(x_ref, w0_ref, b0_ref, w1_ref, b1_ref,
                w2_ref, b2_ref, w3_ref, b3_ref, out_ref):
    # Everything is feature-major: x is (F+n, tb), weights are (out, in),
    # biases are (out, 1) column vectors broadcast along the lane (batch) axis.
    x = x_ref[...]                                                   # (F+n, tb)
    # fused "dst FC + omni FCs + concat" (block-diagonal first layer) + relu
    h = jnp.dot(w0_ref[...], x, preferred_element_type=jnp.float32) + b0_ref[...]
    h = jnp.maximum(h, 0.0)                                          # (d1, tb)
    # linear_1 + relu
    h = jnp.dot(w1_ref[...], h, preferred_element_type=jnp.float32) + b1_ref[...]
    h = jnp.maximum(h, 0.0)                                          # (d1, tb)
    # linear_2 + relu
    h = jnp.dot(w2_ref[...], h, preferred_element_type=jnp.float32) + b2_ref[...]
    h = jnp.maximum(h, 0.0)                                          # (d2, tb)
    # linear_3 (no activation) -> lane-dense (1, tb) output tile
    out_ref[...] = (jnp.dot(w3_ref[...], h,
                            preferred_element_type=jnp.float32) + b3_ref[...])


def _build_first_layer(params, len_dst_p, num_omni):
    """Fold dst_p_net + omni_nets + concat into one block-diagonal layer.

    Returns transposed (feature-major) weight (d1, F+n) and bias (d1, 1).
    """
    n, h1 = num_omni, H_DIM_1
    # W_omni_exp[i, k*20 + j] = delta(i, k) * w_omni[i, j]   -> (n, n*20)
    w_omni_exp = (jnp.eye(n, dtype=jnp.float32)[:, :, None]
                  * params["w_omni"][:, None, :]).reshape(n, n * h1)
    top = jnp.concatenate(
        [params["w_dst"], jnp.zeros((len_dst_p, n * h1), jnp.float32)], axis=1)
    bottom = jnp.concatenate(
        [jnp.zeros((n, h1), jnp.float32), w_omni_exp], axis=1)
    w0 = jnp.concatenate([top, bottom], axis=0)                   # (F+n, d1)
    b0 = jnp.concatenate(
        [params["b_dst"], params["b_omni"].reshape(1, n * h1)], axis=1)  # (1, d1)
    return w0.T, b0.T                                             # (d1, F+n), (d1, 1)


@functools.partial(jax.jit, static_argnames=("tile_b",))
def mlp_predictor_omni_mean(dst_p, omni, params, *, tile_b=512):
    """dst_p: (B, len_dst_p) f32, omni: (num_omni, B, T) f32 -> (B, 1) f32."""
    B, len_dst_p = dst_p.shape
    num_omni = omni.shape[0]
    feat = len_dst_p + num_omni

    # ---- wrapper-side glue (layout plumbing, not compute hoisting) ----
    means = jnp.mean(omni.astype(jnp.float32), axis=2)             # (n, B)
    x_t = jnp.concatenate([dst_p.astype(jnp.float32).T, means], axis=0)  # (F+n, B)

    # Feature-major (transposed) weights / column biases.
    w0t, b0t = _build_first_layer(params, len_dst_p, num_omni)
    weights = (w0t, b0t,
               params["w1"].T, params["b1"].T,
               params["w2"].T, params["b2"].T,
               params["w3"].T, params["b3"].T)

    # Batch tiling along the lane axis: tile_b columns per grid step.
    tb = B if B <= tile_b else tile_b
    n_tiles = pl.cdiv(B, tb)
    b_pad = n_tiles * tb
    if b_pad != B:
        x_t = jnp.pad(x_t, ((0, 0), (0, b_pad - B)))

    col_spec = lambda rows: pl.BlockSpec((rows, tb), lambda i: (0, i))
    const_spec = lambda shape: pl.BlockSpec(shape, lambda i: (0, 0))

    out = pl.pallas_call(
        _mlp_kernel,
        out_shape=jax.ShapeDtypeStruct((1, b_pad), jnp.float32),
        grid=(n_tiles,),
        in_specs=[col_spec(feat)] + [const_spec(w.shape) for w in weights],
        out_specs=col_spec(1),
        compiler_params=pltpu.CompilerParams(
            dimension_semantics=("parallel",)),
    )(x_t, *weights)

    return out[0, :B].reshape(B, 1)


def _reference_forward(dst_p, omni, params):
    """Pure-JAX reference mirroring the PyTorch forward."""
    relu = lambda x: jnp.maximum(x, 0.0)
    h = relu(dst_p @ params["w_dst"] + params["b_dst"])
    for i in range(omni.shape[0]):
        m = omni[i].mean(axis=1, keepdims=True)                    # (B, 1)
        h2 = relu(m @ params["w_omni"][i:i + 1, :] + params["b_omni"][i:i + 1, :])
        h = jnp.concatenate([h, h2], axis=1)
    h3 = relu(h @ params["w1"] + params["b1"])
    h4 = relu(h3 @ params["w2"] + params["b2"])
    return h4 @ params["w3"] + params["b3"]


def init_params(key, len_dst_p, num_omni_pqs):
    n_blocks = 1 + num_omni_pqs
    d1 = H_DIM_1 * n_blocks
    d2 = H_DIM_2 * n_blocks
    ks = jax.random.split(key, 10)
    s = 0.1
    return {
        "w_dst": s * jax.random.normal(ks[0], (len_dst_p, H_DIM_1), jnp.float32),
        "b_dst": s * jax.random.normal(ks[1], (1, H_DIM_1), jnp.float32),
        # one FCLayer(1, 20) per omni stream, stacked: weight row (1,20) -> (n,20)
        "w_omni": s * jax.random.normal(ks[2], (num_omni_pqs, H_DIM_1), jnp.float32),
        "b_omni": s * jax.random.normal(ks[3], (num_omni_pqs, H_DIM_1), jnp.float32),
        "w1": s * jax.random.normal(ks[4], (d1, d1), jnp.float32),
        "b1": s * jax.random.normal(ks[5], (1, d1), jnp.float32),
        "w2": s * jax.random.normal(ks[6], (d1, d2), jnp.float32),
        "b2": s * jax.random.normal(ks[7], (1, d2), jnp.float32),
        "w3": s * jax.random.normal(ks[8], (d2, 1), jnp.float32),
        "b3": s * jax.random.normal(ks[9], (1, 1), jnp.float32),
    }


if __name__ == "__main__":
    LEN_DST_P = 16   # dst_p feature length
    NUM_OMNI = 3     # num_omni_pqs (number of entries in omni_data dict)
    T = 8            # sequence length of each omni value (mean over axis=1)
    # `phase` is stored on the module but unused in forward, so it is omitted.

    key = jax.random.PRNGKey(0)
    k_in, k_omni, k_par, k_in2, k_omni2 = jax.random.split(key, 5)
    params = init_params(k_par, LEN_DST_P, NUM_OMNI)

    # small-shape single-tile case
    B = 8
    dst_p = jax.random.normal(k_in, (B, LEN_DST_P), jnp.float32)
    omni = jax.random.normal(k_omni, (NUM_OMNI, B, T), jnp.float32)
    out = jax.block_until_ready(mlp_predictor_omni_mean(dst_p, omni, params))
    ref = _reference_forward(dst_p, omni, params)
    assert out.shape == (B, 1), out.shape
    assert jnp.allclose(out, ref, atol=1e-4, rtol=1e-4)

    # larger batch exercising the grid + padding path (multiple tiles of 256)
    B2 = 520
    dst_p2 = jax.random.normal(k_in2, (B2, LEN_DST_P), jnp.float32)
    omni2 = jax.random.normal(k_omni2, (NUM_OMNI, B2, T), jnp.float32)
    out2 = jax.block_until_ready(
        mlp_predictor_omni_mean(dst_p2, omni2, params, tile_b=256))
    ref2 = _reference_forward(dst_p2, omni2, params)
    assert out2.shape == (B2, 1), out2.shape
    assert jnp.allclose(out2, ref2, atol=1e-4, rtol=1e-4)

    print("KERNEL_OK")
</pallas_src>

<mosaic_0001>
module attributes {stable_mosaic.version = 11 : i64} {
  func.func @_mlp_kernel(%arg0: i32, %arg1: memref<19x8xf32, #tpu.memory_space<vmem>>, %arg2: memref<80x19xf32, #tpu.memory_space<vmem>>, %arg3: memref<80x1xf32, #tpu.memory_space<vmem>>, %arg4: memref<80x80xf32, #tpu.memory_space<vmem>>, %arg5: memref<80x1xf32, #tpu.memory_space<vmem>>, %arg6: memref<20x80xf32, #tpu.memory_space<vmem>>, %arg7: memref<20x1xf32, #tpu.memory_space<vmem>>, %arg8: memref<1x20xf32, #tpu.memory_space<vmem>>, %arg9: memref<1x1xf32, #tpu.memory_space<vmem>>, %arg10: memref<1x8xf32, #tpu.memory_space<vmem>>) attributes {dimension_semantics = [#tpu.dimension_semantics<parallel>], iteration_bounds = array<i64: 1>, scalar_prefetch = 0 : i64, scratch_operands = 0 : i64, tpu.core_type = #tpu.core_type<tc>, window_params = [{transform_indices = @transform_0, window_bounds = array<i64: 19, 8>}, {pipeline_mode = #tpu.pipeline_mode<synchronous>, transform_indices = @transform_1, window_bounds = array<i64: 80, 19>}, {pipeline_mode = #tpu.pipeline_mode<synchronous>, transform_indices = @transform_2, window_bounds = array<i64: 80, 1>}, {pipeline_mode = #tpu.pipeline_mode<synchronous>, transform_indices = @transform_3, window_bounds = array<i64: 80, 80>}, {pipeline_mode = #tpu.pipeline_mode<synchronous>, transform_indices = @transform_4, window_bounds = array<i64: 80, 1>}, {pipeline_mode = #tpu.pipeline_mode<synchronous>, transform_indices = @transform_5, window_bounds = array<i64: 20, 80>}, {pipeline_mode = #tpu.pipeline_mode<synchronous>, transform_indices = @transform_6, window_bounds = array<i64: 20, 1>}, {pipeline_mode = #tpu.pipeline_mode<synchronous>, transform_indices = @transform_7, window_bounds = array<i64: 1, 20>}, {pipeline_mode = #tpu.pipeline_mode<synchronous>, transform_indices = @transform_8, window_bounds = array<i64: 1, 1>}, {transform_indices = @transform_9, window_bounds = array<i64: 1, 8>}]} {
    %c0 = arith.constant 0 : index
    %c0_0 = arith.constant 0 : index
    %0 = vector.load %arg1[%c0, %c0_0] : memref<19x8xf32, #tpu.memory_space<vmem>>, vector<19x8xf32>
    %c0_1 = arith.constant 0 : index
    %c0_2 = arith.constant 0 : index
    %1 = vector.load %arg2[%c0_1, %c0_2] : memref<80x19xf32, #tpu.memory_space<vmem>>, vector<80x19xf32>
    %cst = arith.constant dense<0.000000e+00> : vector<80x8xf32>
    %2 = tpu.matmul %1, %0, %cst {dimension_numbers = #tpu.dot_dimension_numbers<[1], [0], [0], [1], [0, 0, 1, 1], [], []>} : vector<80x19xf32>, vector<19x8xf32>, vector<80x8xf32> -> vector<80x8xf32>
    %c0_3 = arith.constant 0 : index
    %c0_4 = arith.constant 0 : index
    %3 = vector.load %arg3[%c0_3, %c0_4] : memref<80x1xf32, #tpu.memory_space<vmem>>, vector<80x1xf32>
    %4 = vector.broadcast %3 : vector<80x1xf32> to vector<80x8xf32>
    %5 = arith.addf %2, %4 : vector<80x8xf32>
    %cst_5 = arith.constant 0.000000e+00 : f32
    %6 = vector.broadcast %cst_5 : f32 to vector<80x8xf32>
    %7 = arith.maximumf %5, %6 : vector<80x8xf32>
    %c0_6 = arith.constant 0 : index
    %c0_7 = arith.constant 0 : index
    %8 = vector.load %arg4[%c0_6, %c0_7] : memref<80x80xf32, #tpu.memory_space<vmem>>, vector<80x80xf32>
    %cst_8 = arith.constant dense<0.000000e+00> : vector<80x8xf32>
    %9 = tpu.matmul %8, %7, %cst_8 {dimension_numbers = #tpu.dot_dimension_numbers<[1], [0], [0], [1], [0, 0, 1, 1], [], []>} : vector<80x80xf32>, vector<80x8xf32>, vector<80x8xf32> -> vector<80x8xf32>
    %c0_9 = arith.constant 0 : index
    %c0_10 = arith.constant 0 : index
    %10 = vector.load %arg5[%c0_9, %c0_10] : memref<80x1xf32, #tpu.memory_space<vmem>>, vector<80x1xf32>
    %11 = vector.broadcast %10 : vector<80x1xf32> to vector<80x8xf32>
    %12 = arith.addf %9, %11 : vector<80x8xf32>
    %cst_11 = arith.constant 0.000000e+00 : f32
    %13 = vector.broadcast %cst_11 : f32 to vector<80x8xf32>
    %14 = arith.maximumf %12, %13 : vector<80x8xf32>
    %c0_12 = arith.constant 0 : index
    %c0_13 = arith.constant 0 : index
    %15 = vector.load %arg6[%c0_12, %c0_13] : memref<20x80xf32, #tpu.memory_space<vmem>>, vector<20x80xf32>
    %cst_14 = arith.constant dense<0.000000e+00> : vector<20x8xf32>
    %16 = tpu.matmul %15, %14, %cst_14 {dimension_numbers = #tpu.dot_dimension_numbers<[1], [0], [0], [1], [0, 0, 1, 1], [], []>} : vector<20x80xf32>, vector<80x8xf32>, vector<20x8xf32> -> vector<20x8xf32>
    %c0_15 = arith.constant 0 : index
    %c0_16 = arith.constant 0 : index
    %17 = vector.load %arg7[%c0_15, %c0_16] : memref<20x1xf32, #tpu.memory_space<vmem>>, vector<20x1xf32>
    %18 = vector.broadcast %17 : vector<20x1xf32> to vector<20x8xf32>
    %19 = arith.addf %16, %18 : vector<20x8xf32>
    %cst_17 = arith.constant 0.000000e+00 : f32
    %20 = vector.broadcast %cst_17 : f32 to vector<20x8xf32>
    %21 = arith.maximumf %19, %20 : vector<20x8xf32>
    %c0_18 = arith.constant 0 : index
    %c0_19 = arith.constant 0 : index
    %22 = vector.load %arg8[%c0_18, %c0_19] : memref<1x20xf32, #tpu.memory_space<vmem>>, vector<1x20xf32>
    %cst_20 = arith.constant dense<0.000000e+00> : vector<1x8xf32>
    %23 = tpu.matmul %22, %21, %cst_20 {dimension_numbers = #tpu.dot_dimension_numbers<[1], [0], [0], [1], [0, 0, 1, 1], [], []>} : vector<1x20xf32>, vector<20x8xf32>, vector<1x8xf32> -> vector<1x8xf32>
    %c0_21 = arith.constant 0 : index
    %c0_22 = arith.constant 0 : index
    %24 = vector.load %arg9[%c0_21, %c0_22] : memref<1x1xf32, #tpu.memory_space<vmem>>, vector<1x1xf32>
    %25 = vector.broadcast %24 : vector<1x1xf32> to vector<1x8xf32>
    %26 = arith.addf %23, %25 : vector<1x8xf32>
    %c0_23 = arith.constant 0 : index
    %c0_24 = arith.constant 0 : index
    %27 = vector.load %arg10[%c0_23, %c0_24] : memref<1x8xf32, #tpu.memory_space<vmem>>, vector<1x8xf32>
    tpu.vector_store %arg10[%c0_23, %c0_24], %26 {strides = array<i32>} : memref<1x8xf32, #tpu.memory_space<vmem>>, vector<1x8xf32>,
    return
  }
  func.func @transform_0(%arg0: i32) -> (i32, i32) {
    %c0_i32 = arith.constant 0 : i32
    %c0_i32_0 = arith.constant 0 : i32
    return %c0_i32, %arg0 : i32, i32
  }
  func.func @transform_1(%arg0: i32) -> (i32, i32) {
    %c0_i32 = arith.constant 0 : i32
    %c0_i32_0 = arith.constant 0 : i32
    %c0_i32_1 = arith.constant 0 : i32
    return %c0_i32, %c0_i32_0 : i32, i32
  }
  func.func @transform_2(%arg0: i32) -> (i32, i32) {
    %c0_i32 = arith.constant 0 : i32
    %c0_i32_0 = arith.constant 0 : i32
    %c0_i32_1 = arith.constant 0 : i32
    return %c0_i32, %c0_i32_0 : i32, i32
  }
  func.func @transform_3(%arg0: i32) -> (i32, i32) {
    %c0_i32 = arith.constant 0 : i32
    %c0_i32_0 = arith.constant 0 : i32
    %c0_i32_1 = arith.constant 0 : i32
    return %c0_i32, %c0_i32_0 : i32, i32
  }
  func.func @transform_4(%arg0: i32) -> (i32, i32) {
    %c0_i32 = arith.constant 0 : i32
    %c0_i32_0 = arith.constant 0 : i32
    %c0_i32_1 = arith.constant 0 : i32
    return %c0_i32, %c0_i32_0 : i32, i32
  }
  func.func @transform_5(%arg0: i32) -> (i32, i32) {
    %c0_i32 = arith.constant 0 : i32
    %c0_i32_0 = arith.constant 0 : i32
    %c0_i32_1 = arith.constant 0 : i32
    return %c0_i32, %c0_i32_0 : i32, i32
  }
  func.func @transform_6(%arg0: i32) -> (i32, i32) {
    %c0_i32 = arith.constant 0 : i32
    %c0_i32_0 = arith.constant 0 : i32
    %c0_i32_1 = arith.constant 0 : i32
    return %c0_i32, %c0_i32_0 : i32, i32
  }
  func.func @transform_7(%arg0: i32) -> (i32, i32) {
    %c0_i32 = arith.constant 0 : i32
    %c0_i32_0 = arith.constant 0 : i32
    %c0_i32_1 = arith.constant 0 : i32
    return %c0_i32, %c0_i32_0 : i32, i32
  }
  func.func @transform_8(%arg0: i32) -> (i32, i32) {
    %c0_i32 = arith.constant 0 : i32
    %c0_i32_0 = arith.constant 0 : i32
    %c0_i32_1 = arith.constant 0 : i32
    return %c0_i32, %c0_i32_0 : i32, i32
  }
  func.func @transform_9(%arg0: i32) -> (i32, i32) {
    %c0_i32 = arith.constant 0 : i32
    %c0_i32_0 = arith.constant 0 : i32
    return %c0_i32, %arg0 : i32, i32
  }
}

</mosaic_0001>

<bundles_post_ra>
// kernel: mlp_predictor_omni_mean.1
= control target key start
LH: loop header
LB: loop body
LE: loop exit
PB: predicated region body
PF: predicated region fallthrough
CT: control target
= control target key end

     0   :  { %s1164_s0 = inlined_call_operand.vmem [shape: f32[19,8], index: 0, kind: input, shape index: {}]   ;;  %s1165_s1 = inlined_call_operand.vmem [shape: f32[80,19], index: 1, kind: input, shape index: {}]   ;;  %s1166_s2 = inlined_call_operand.vmem [shape: f32[80,1], index: 2, kind: input, shape index: {}]   ;;  %s1167_s3 = inlined_call_operand.vmem [shape: f32[80,80], index: 3, kind: input, shape index: {}]   ;;  %s1168_s4 = inlined_call_operand.vmem [shape: f32[80,1], index: 4, kind: input, shape index: {}]   ;;  %s1169_s5 = inlined_call_operand.vmem [shape: f32[20,80], index: 5, kind: input, shape index: {}]   ;;  %s1170_s6 = inlined_call_operand.vmem [shape: f32[20,1], index: 6, kind: input, shape index: {}]   ;;  %s1171_s7 = inlined_call_operand.vmem [shape: f32[1,20], index: 7, kind: input, shape index: {}]   ;;  %s1172_s8 = inlined_call_operand.<no memory space> [shape: f32[1,1], index: 8, kind: input, shape index: {}]   ;;  %s1173_s9 = inlined_call_operand.hbm [shape: f32[1,8], index: 9, kind: output, shape index: {}]  }
   0x1   :  { %v14_v0 = vstv %s1172_s8 }
   0x2   :  { %15 = vst [vmem:[#allocation2] sm:$0x1] %v14_v0 }
   0x3   :  { %v37_v1 = vld [vmem:[%s1164_s0 + $0x10] sm:$0x7]  ;;  %vm139_vm0 = vcmask 1042432   ;;  %v36_v2 = vld [vmem:[%s1164_s0 + $0x8] sm:$0xff]  ;;  %vm108_vm1 = vcmask 154624   ;;  %v38_v3 = vld [vmem:[%s1165_s1] sm:$0xff] }
   0x4   :  { %788 = vmatprep.subr.msk.mxu0 %vm139_vm0, %v37_v1  ;;  %v35_v4 = vld [vmem:[%s1164_s0] sm:$0xff]  ;;  %794 = vmatprep.mubr.msk.f32.mxu0 %vm108_vm1, %v38_v3  ;;  %v910_v5 = vmov 0   ;;  %v39_v6 = vld [vmem:[%s1165_s1 + $0x8] sm:$0xff]  ;;  %v40_v8 = vld [vmem:[%s1165_s1 + $0x10] sm:$0xff] }
   0x5   :  { %789 = vmatpush3.msk.msra.mxu0 %vm139_vm0, %v37_v1  ;;  %886 = vset.pattern.permute.xlu0 %v910_v5  ;;  %v57_v7 = vld [vmem:[%s1166_s2 + $0x48] sm:$0xff]  ;;  %v55_v9 = vld [vmem:[%s1166_s2 + $0x38] sm:$0xff]  ;;  %v56_v10 = vld [vmem:[%s1166_s2 + $0x40] sm:$0xff] }
   0x6   :  { %790 = vmatprep.subr.mxu0 %v36_v2  ;;  %887 = vset.pattern.permute.xlu1 %v910_v5  ;;  %v54_v11 = vld [vmem:[%s1166_s2 + $0x30] sm:$0xff]  ;;  %v41_v12 = vld [vmem:[%s1165_s1 + $0x18] sm:$0xff]  ;;  %v42_v13 = vld [vmem:[%s1165_s1 + $0x20] sm:$0xff] }
   0x7   :  { %791 = vmatpush3.msra.mxu0 %v36_v2  ;;  %105 = vperm.xlu0 %886, %v57_v7   ;;  %v53_v14 = vld [vmem:[%s1166_s2 + $0x28] sm:$0xff]  ;;  %v52_v15 = vld [vmem:[%s1166_s2 + $0x20] sm:$0xff] }
   0x8   :  { %792 = vmatprep.subr.mxu0 %v35_v4  ;;  %95 = vperm.xlu1 %887, %v55_v9   ;;  %v43_v16 = vld [vmem:[%s1165_s1 + $0x28] sm:$0xff] }
   0x9   :  { %793 = vmatpush3.msra.mxu0 %v35_v4 }
   0xa   :  { %795 = vmatmul.mubr.msk.f32.vlgmr.msra.gmra.mxu0 %vm108_vm1, %v39_v6 }
   0xb   :  { %797 = vmatprep.mubr.msk.f32.mxu0 %vm108_vm1, %v40_v8  ;;  %100 = vperm.xlu0 %886, %v56_v10  }
   0xc   :  { %90 = vperm.xlu1 %887, %v54_v11  }
   0xe   :  { %798 = vmatmul.mubr.msk.f32.gmra.mxu0 %vm108_vm1, %v41_v12 }
   0xf   :  { %800 = vmatprep.mubr.msk.f32.mxu0 %vm108_vm1, %v42_v13 }
  0x10   :  { %16 = vsyncpa [#allocation4], 0  ;;  %v44_v17 = vld [vmem:[%s1165_s1 + $0x30] sm:$0xff]  ;;  %85 = vperm.xlu0 %886, %v53_v14   ;;  %80 = vperm.xlu1 %887, %v52_v15   ;;  %v51_v18 = vld [vmem:[%s1166_s2 + $0x18] sm:$0xff]  ;;  %vm338_vm2 = vcmask 654336   ;;  %vm912_vm3 = vmmov 0  }
  0x11   :  { %v50_v19 = vld [vmem:[%s1166_s2 + $0x10] sm:$0xff]  ;;  %v45_v20 = vld [vmem:[%s1165_s1 + $0x38] sm:$0xff]  ;;  %v46_v21 = vld [vmem:[%s1165_s1 + $0x40] sm:$0xff]  ;;  %vm622_vm4 = vcmask 1043456   ;;  %vm618_vm5 = vcmask 162816   ;;  %s913_s11 = smov [#allocation3]  }
  0x12   :  { %801 = vmatmul.mubr.msk.f32.gmra.mxu0 %vm108_vm1, %v43_v16  ;;  %v49_v22 = vld [vmem:[%s1166_s2 + $0x8] sm:$0xff]  ;;  %v48_v23 = vld [vmem:[%s1166_s2] sm:$0xff]  ;;  %v285_v27 = vld [vmem:[%s1168_s4 + $0x38] sm:$0xff]  ;;  %vm696_vm6 = vcmask 57344  }
  0x13   :  { %803 = vmatprep.mubr.msk.f32.mxu0 %vm108_vm1, %v44_v17  ;;  %v47_v24 = vld [vmem:[%s1165_s1 + $0x48] sm:$0xff]  ;;  %v286_v26 = vld [vmem:[%s1168_s4 + $0x40] sm:$0xff]  ;;  %v284_v28 = vld [vmem:[%s1168_s4 + $0x30] sm:$0xff] }
  0x14   :  { %75 = vperm.xlu0 %886, %v51_v18   ;;  %70 = vperm.xlu1 %887, %v50_v19   ;;  %v287_v25 = vld [vmem:[%s1168_s4 + $0x48] sm:$0xff]  ;;  %v282_v30 = vld [vmem:[%s1168_s4 + $0x20] sm:$0xff]  ;;  %v281_v31 = vld [vmem:[%s1168_s4 + $0x18] sm:$0xff] }
  0x15   :  { %v283_v29 = vld [vmem:[%s1168_s4 + $0x28] sm:$0xff]  ;;  %v280_v32 = vld [vmem:[%s1168_s4 + $0x10] sm:$0xff]  ;;  %v278_v34 = vld [vmem:[%s1168_s4] sm:$0xff] }
  0x16   :  { %804 = vmatmul.mubr.msk.f32.gmra.mxu0 %vm108_vm1, %v45_v20  ;;  %v279_v33 = vld [vmem:[%s1168_s4 + $0x8] sm:$0xff]  ;;  %v499_v35 = vld [vmem:[%s1170_s6 + $0x10] sm:$0xf]  ;;  %v497_v37 = vld [vmem:[%s1170_s6] sm:$0xff]  ;;  %s704_s4 = sshll.u32 %s913_s11, 4  ;;  %s705_s4 = int_to_ptr.vmem [resolvable:$true] %s704_s4 }
  0x17   :  { %806 = vmatprep.mubr.msk.f32.mxu0 %vm108_vm1, %v46_v21  ;;  %v498_v36 = vld [vmem:[%s1170_s6 + $0x8] sm:$0xff]  ;;  %v608_v38 = vld [vmem:[#allocation2] sm:$0x1]  ;;  %v270_v17 = vld [vmem:[%s1167_s3 + $0x10] sm:$0xff]  ;;  %s888_s12 = scalar_lea.vmem %s705_s4, 16  ;;  %p893_p1 = scmp.lt.s32.totalorder %s705_s4, %s705_s4 }
  0x18   :  { %65 = vperm.xlu0 %886, %v49_v22   ;;  %60 = vperm.xlu1 %887, %v48_v23   ;;  %v268_v39 = vld [vmem:[%s1167_s3] sm:$0xff]  ;;  %v269_v16 = vld [vmem:[%s1167_s3 + $0x8] sm:$0xff]  ;;  %v271_v18 = vld [vmem:[%s1167_s3 + $0x18] sm:$0xff]  ;;  %p889_p0 = scmp.ne.s32.totalorder %s705_s4, %s888_s12 }
  0x19   :  { %829 = vmatprep.mubr.msk.f32.mxu1 %vm338_vm2, %v268_v39  ;;  %v272_v19 = vld [vmem:[%s1167_s3 + $0x20] sm:$0xff]  ;;  %v273_v20 = vld [vmem:[%s1167_s3 + $0x28] sm:$0xff]  ;;  %v274_v21 = vld [vmem:[%s1167_s3 + $0x30] sm:$0xff] }
  0x1a   :  { %807 = vmatmul.mubr.msk.f32.gmra.mxu0 %vm108_vm1, %v47_v24  ;;  %v275_v22 = vld [vmem:[%s1167_s3 + $0x38] sm:$0xff]  ;;  %v276_v23 = vld [vmem:[%s1167_s3 + $0x40] sm:$0xff]  ;;  %v277_v24 = vld [vmem:[%s1167_s3 + $0x48] sm:$0xff] }
  0x1c   :  { %335 = vperm.xlu0 %886, %v287_v25   ;;  %330 = vperm.xlu1 %887, %v286_v26   ;;  %v911_v25 = vmov 0.0  }
  0x1d   :  { %844 = vmatprep.subr.mxu0 %v911_v25  ;;  %864 = vmatprep.mubr.msk.f32.mxu0 %vm912_vm3, %v911_v25 }
  0x20   :  { %325 = vperm.xlu0 %886, %v285_v27   ;;  %320 = vperm.xlu1 %887, %v284_v28  }
  0x24   :  { %315 = vperm.xlu0 %886, %v283_v29   ;;  %310 = vperm.xlu1 %887, %v282_v30  }
  0x28   :  { %305 = vperm.xlu0 %886, %v281_v31   ;;  %300 = vperm.xlu1 %887, %v280_v32  }
  0x2c   :  { %295 = vperm.xlu0 %886, %v279_v33   ;;  %290 = vperm.xlu1 %887, %v278_v34  }
  0x30   :  { %512 = vperm.xlu0 %886, %v499_v35   ;;  %507 = vperm.xlu1 %887, %v498_v36  }
  0x34   :  { %502 = vperm.xlu0 %886, %v497_v37   ;;  %611 = vperm.xlu1 %887, %v608_v38  }
  0x82   :  { %v106_v43 = vpop.permute.xlu0 %105 }
  0x83   :  { %v96_v45 = vpop.permute.xlu1 %95 }
  0x86   :  { %v101_v48 = vpop.permute.xlu0 %100 }
  0x87   :  { %v91_v50 = vpop.permute.xlu1 %90 }
  0x8b   :  { %v86_v54 = vpop.permute.xlu0 %85  ;;  %v81_v59 = vpop.permute.xlu1 %80 }
  0x8f   :  { %v76_v0 = vpop.permute.xlu0 %75  ;;  %v71_v3 = vpop.permute.xlu1 %70 }
  0x93   :  { %v66_v8 = vpop.permute.xlu0 %65  ;;  %v61_v11 = vpop.permute.xlu1 %60 }
  0x97   :  { %v336_v29 = vpop.permute.xlu0 %335  ;;  %v331_v31 = vpop.permute.xlu1 %330 }
  0x9b   :  { %v326_v34 = vpop.permute.xlu0 %325  ;;  %v321_v36 = vpop.permute.xlu1 %320 }
  0xca   :  { %v796_v40 = vpop.f32.mrf.mxu0 }
  0xcb   :  { %v215_v9 = vadd.f32 %v796_v40, %v66_v8  ;;  %v316_v40 = vpop.permute.xlu0 %315 }
  0xcc   :  { %v209_v41 = vpop.f32.mrf.mxu0 }
  0xcd   :  { %v210_v12 = vadd.f32 %v209_v41, %v61_v11  ;;  %v259_v14 = vmax.f32 %v215_v9, 0.0 }
  0xce   :  { %v799_v42 = vpop.f32.mrf.mxu0 }
  0xcf   :  { %v225_v4 = vadd.f32 %v799_v42, %v76_v0  ;;  %v258_v15 = vmax.f32 %v210_v12, 0.0 }
  0xd0   :  { %v219_v44 = vpop.f32.mrf.mxu0 }
  0xd1   :  { %v220_v6 = vadd.f32 %v219_v44, %v71_v3  ;;  %v261_v10 = vmax.f32 %v225_v4, 0.0  ;;  %v495_v3 = vld [vmem:[%s1169_s5 + $0x8] sm:$0xff]  ;;  %v496_v4 = vld [vmem:[%s1169_s5 + $0x10] sm:$0xf] }
  0xd2   :  { %v802_v46 = vpop.f32.mrf.mxu0 }
  0xd3   :  { %v235_v62 = vadd.f32 %v802_v46, %v86_v54  ;;  %v260_v13 = vmax.f32 %v220_v6, 0.0 }
  0xd4   :  { %v229_v47 = vpop.f32.mrf.mxu0 }
  0xd5   :  { %v230_v1 = vadd.f32 %v229_v47, %v81_v59  ;;  %v263_v5 = vmax.f32 %v235_v62, 0.0 }
  0xd6   :  { %v805_v49 = vpop.f32.mrf.mxu0 }
  0xd7   :  { %v245_v56 = vadd.f32 %v805_v49, %v96_v45  ;;  %v262_v7 = vmax.f32 %v230_v1, 0.0  ;;  %v311_v45 = vpop.permute.xlu1 %310 }
  0xd8   :  { %v239_v51 = vpop.f32.mrf.mxu0 }
  0xd9   :  { %v240_v60 = vadd.f32 %v239_v51, %v91_v50  ;;  %v265_v63 = vmax.f32 %v245_v56, 0.0  ;;  %v306_v50 = vpop.permute.xlu0 %305 }
  0xda   :  { %v808_v52 = vpop.f32.mrf.mxu0 }
  0xdb   :  { %v255_v53 = vadd.f32 %v808_v52, %v106_v43  ;;  %v264_v2 = vmax.f32 %v240_v60, 0.0 }
  0xdc   :  { %v249_v55 = vpop.f32.mrf.mxu0 }
  0xdd   :  { %v267_v57 = vmax.f32 %v255_v53, 0.0  ;;  %v250_v58 = vadd.f32 %v249_v55, %v101_v48  ;;  %v301_v53 = vpop.permute.xlu1 %300 }
  0xdf   :  { %v266_v61 = vmax.f32 %v250_v58, 0.0  ;;  %809 = vmatprep.subr.mxu1 %v267_v57  ;;  %v296_v58 = vpop.permute.xlu0 %295 }
  0xe0   :  { %810 = vmatpush3.msra.mxu1 %v267_v57 }
  0xe1   :  { %811 = vmatprep.subr.mxu1 %v266_v61 }
  0xe2   :  { %812 = vmatpush3.msra.mxu1 %v266_v61  ;;  %v291_v61 = vpop.permute.xlu1 %290 }
  0xe3   :  { %813 = vmatprep.subr.mxu1 %v265_v63 }
  0xe4   :  { %814 = vmatpush3.msra.mxu1 %v265_v63 }
  0xe5   :  { %815 = vmatprep.subr.mxu1 %v264_v2 }
  0xe6   :  { %816 = vmatpush3.msra.mxu1 %v264_v2  ;;  %v494_v2 = vld [vmem:[%s1169_s5] sm:$0xff] }
  0xe7   :  { %817 = vmatprep.subr.mxu1 %v263_v5 }
  0xe8   :  { %818 = vmatpush3.msra.mxu1 %v263_v5 }
  0xe9   :  { %819 = vmatprep.subr.mxu1 %v262_v7 }
  0xea   :  { %820 = vmatpush3.msra.mxu1 %v262_v7  ;;  %v513_v7 = vpop.permute.xlu0 %512 }
  0xeb   :  { %821 = vmatprep.subr.mxu1 %v261_v10 }
  0xec   :  { %822 = vmatpush3.msra.mxu1 %v261_v10  ;;  %v508_v10 = vpop.permute.xlu1 %507 }
  0xed   :  { %823 = vmatprep.subr.mxu1 %v260_v13 }
  0xee   :  { %824 = vmatpush3.msra.mxu1 %v260_v13 }
  0xef   :  { %825 = vmatprep.subr.mxu1 %v259_v14 }
  0xf0   :  { %826 = vmatpush3.msra.mxu1 %v259_v14  ;;  %v503_v14 = vpop.permute.xlu0 %502 }
  0xf1   :  { %827 = vmatprep.subr.mxu1 %v258_v15 }
  0xf2   :  { %828 = vmatpush3.msra.mxu1 %v258_v15 }
  0xf3   :  { %830 = vmatmul.mubr.msk.f32.vlgmr.msra.gmra.mxu1 %vm338_vm2, %v269_v16 }
  0xf4   :  { %832 = vmatprep.mubr.msk.f32.mxu1 %vm338_vm2, %v270_v17 }
  0xf7   :  { %833 = vmatmul.mubr.msk.f32.gmra.mxu1 %vm338_vm2, %v271_v18 }
  0xf8   :  { %835 = vmatprep.mubr.msk.f32.mxu1 %vm338_vm2, %v272_v19 }
  0xfb   :  { %836 = vmatmul.mubr.msk.f32.gmra.mxu1 %vm338_vm2, %v273_v20  ;;  %v607_v20 = vld [vmem:[%s1171_s7] sm:$0x1]  ;;  %s892_s7 = scalar_lea.vmem %s705_s4, 32 }
  0xfc   :  { %838 = vmatprep.mubr.msk.f32.mxu1 %vm338_vm2, %v274_v21  ;;  %v614_v21 = vlaneseq  ;;  %p894_p2 = scmp.lt.s32.totalorder %s892_s7, %s888_s12 }
  0xfe   :  { %p895_p3 = por %p894_p2, %p893_p1 }
  0xff   :  { %839 = vmatmul.mubr.msk.f32.gmra.mxu1 %vm338_vm2, %v275_v22  ;;  %v615_v22 = vshrl.u32 %v614_v21, 7 }
 0x100   :  { %841 = vmatprep.mubr.msk.f32.mxu1 %vm338_vm2, %v276_v23  ;;  %p896_p4 = pnand %p895_p3, %p889_p0 }
 0x101   :  { %v616_v23 = vsub.s32 0, %v615_v22 }
 0x103   :  { %842 = vmatmul.mubr.msk.f32.gmra.mxu1 %vm338_vm2, %v277_v24  ;;  %v612_v24 = vpop.permute.xlu1 %611 }
 0x1b3   :  { %v831_v26 = vpop.f32.mrf.mxu1 }
 0x1b4   :  { %v441_v59 = vadd.f32 %v831_v26, %v296_v58  ;;  %v617_v26 = vrot.slane %v612_v24, %v616_v23 }
 0x1b5   :  { %v435_v27 = vpop.f32.mrf.mxu1 }
 0x1b6   :  { %v436_v62 = vadd.f32 %v435_v27, %v291_v61  ;;  %v485_v0 = vmax.f32 %v441_v59, 0.0 }
 0x1b7   :  { %v834_v28 = vpop.f32.mrf.mxu1 }
 0x1b8   :  { %v451_v54 = vadd.f32 %v834_v28, %v306_v50  ;;  %v484_v1 = vmax.f32 %v436_v62, 0.0 }
 0x1b9   :  { %v445_v30 = vpop.f32.mrf.mxu1 }
 0x1ba   :  { %v446_v56 = vadd.f32 %v445_v30, %v301_v53  ;;  %v487_v60 = vmax.f32 %v451_v54, 0.0 }
 0x1bb   :  { %v837_v32 = vpop.f32.mrf.mxu1 }
 0x1bc   :  { %v461_v48 = vadd.f32 %v837_v32, %v316_v40  ;;  %v486_v63 = vmax.f32 %v446_v56, 0.0 }
 0x1bd   :  { %v455_v33 = vpop.f32.mrf.mxu1 }
 0x1be   :  { %v456_v51 = vadd.f32 %v455_v33, %v311_v45  ;;  %v489_v55 = vmax.f32 %v461_v48, 0.0 }
 0x1bf   :  { %v840_v35 = vpop.f32.mrf.mxu1 }
 0x1c0   :  { %v471_v42 = vadd.f32 %v840_v35, %v326_v34  ;;  %v488_v57 = vmax.f32 %v456_v51, 0.0 }
 0x1c1   :  { %v465_v37 = vpop.f32.mrf.mxu1 }
 0x1c2   :  { %v466_v46 = vadd.f32 %v465_v37, %v321_v36  ;;  %v491_v49 = vmax.f32 %v471_v42, 0.0 }
 0x1c3   :  { %v843_v38 = vpop.f32.mrf.mxu1 }
 0x1c4   :  { %v481_v39 = vadd.f32 %v843_v38, %v336_v29  ;;  %v490_v52 = vmax.f32 %v466_v46, 0.0 }
 0x1c5   :  { %v475_v41 = vpop.f32.mrf.mxu1 }
 0x1c6   :  { %v493_v43 = vmax.f32 %v481_v39, 0.0  ;;  %v476_v44 = vadd.f32 %v475_v41, %v331_v31 }
 0x1c8   :  { %v492_v47 = vmax.f32 %v476_v44, 0.0  ;;  %845 = vmatpush3.msra.mxu0 %v493_v43 }
 0x1c9   :  { %846 = vmatprep.subr.mxu0 %v911_v25 }
 0x1ca   :  { %847 = vmatpush3.msra.mxu0 %v492_v47 }
 0x1cb   :  { %848 = vmatprep.subr.mxu0 %v911_v25 }
 0x1cc   :  { %849 = vmatpush3.msra.mxu0 %v491_v49 }
 0x1cd   :  { %850 = vmatprep.subr.mxu0 %v911_v25 }
 0x1ce   :  { %851 = vmatpush3.msra.mxu0 %v490_v52 }
 0x1cf   :  { %852 = vmatprep.subr.mxu0 %v911_v25 }
 0x1d0   :  { %853 = vmatpush3.msra.mxu0 %v489_v55 }
 0x1d1   :  { %854 = vmatprep.subr.mxu0 %v911_v25 }
 0x1d2   :  { %855 = vmatpush3.msra.mxu0 %v488_v57 }
 0x1d3   :  { %856 = vmatprep.subr.mxu0 %v911_v25 }
 0x1d4   :  { %857 = vmatpush3.msra.mxu0 %v487_v60 }
 0x1d5   :  { %858 = vmatprep.subr.mxu0 %v911_v25 }
 0x1d6   :  { %859 = vmatpush3.msra.mxu0 %v486_v63 }
 0x1d7   :  { %860 = vmatprep.subr.mxu0 %v911_v25 }
 0x1d8   :  { %861 = vmatpush3.msra.mxu0 %v485_v0 }
 0x1d9   :  { %862 = vmatprep.subr.mxu0 %v911_v25 }
 0x1da   :  { %863 = vmatpush3.msra.mxu0 %v484_v1 }
 0x1db   :  { %865 = vmatmul.mubr.msk.f32.vlgmr.msra.gmra.mxu0 %vm338_vm2, %v494_v2  ;;  %873 = vmatprep.subr.mxu0 %v911_v25 }
 0x1dc   :  { %867 = vmatprep.mubr.msk.f32.mxu0 %vm912_vm3, %v911_v25 }
 0x1df   :  { %868 = vmatmul.mubr.msk.f32.gmra.mxu0 %vm338_vm2, %v495_v3 }
 0x1e0   :  { %870 = vmatprep.mubr.msk.f32.mxu0 %vm912_vm3, %v911_v25 }
 0x1e3   :  { %871 = vmatmul.mubr.msk.f32.gmra.mxu0 %vm338_vm2, %v496_v4 }
 0x1e4   :  { %879 = vmatprep.mubr.msk.f32.mxu0 %vm912_vm3, %v911_v25 }
 0x29b   :  { %v590_v5 = vpop.f32.mrf.mxu0 }
 0x29c   :  { %v591_v16 = vadd.f32 %v590_v5, %v503_v14 }
 0x29d   :  { %v866_v6 = vpop.f32.mrf.mxu0 }
 0x29e   :  { %v604_v19 = vmax.f32 %v591_v16, 0.0 }
 0x29f   :  { %v595_v8 = vpop.f32.mrf.mxu0 }
 0x2a0   :  { %v596_v12 = vadd.f32 %v595_v8, %v508_v10 }
 0x2a1   :  { %v869_v9 = vpop.f32.mrf.mxu0 }
 0x2a2   :  { %v605_v18 = vmax.f32 %v596_v12, 0.0 }
 0x2a3   :  { %v600_v11 = vpop.f32.mrf.mxu0 }
 0x2a4   :  { %v601_v13 = vadd.f32 %v600_v11, %v513_v7 }
 0x2a5   :  { %v872_v15 = vpop.f32.mrf.mxu0 }
 0x2a6   :  { %v606_v17 = vmax.f32 %v601_v13, 0.0 }
 0x2a8   :  { %874 = vmatpush3.msk.msra.mxu0 %vm622_vm4, %v606_v17 }
 0x2a9   :  { %875 = vmatprep.subr.mxu0 %v911_v25 }
 0x2aa   :  { %876 = vmatpush3.msra.mxu0 %v605_v18 }
 0x2ab   :  { %877 = vmatprep.subr.mxu0 %v911_v25 }
 0x2ac   :  { %878 = vmatpush3.msra.mxu0 %v604_v19 }
 0x2ad   :  { %880 = vmatmul.mubr.msk.f32.vlgmr.msra.gmra.mxu0 %vm618_vm5, %v607_v20 }
 0x36d   :  { %v692_v27 = vpop.f32.mrf.mxu0 }
 0x36e   :  { %v693_v28 = vadd.f32 %v692_v27, %v617_v26 }
 0x36f   :  { %v881_v29 = vpop.f32.mrf.mxu0 }
 0x370   :  { %697 = vst.msk [vmem:[#allocation3] sm:$0x1] %vm696_vm6, %v693_v28 }
 0x371   :  { %899 = shalt.err (!%p896_p4)
}
 0x372   :  { %707 = dma.vmem_to_hbm [thread:$0]  %s705_s4, 16, %s1173_s9, [#allocation4]  }
 0x373   :  { %908 = dma.done.wait [#allocation4], 16  }
 0x374   :  { %909 = vsyncadd [#allocation4], 4294967280 }
 0x375   :  { %711 = vsyncpa [#allocation4], 1 }

</bundles_post_ra>
